<compile_context>
chip_gen: v7x
topology: tpu7x:2x2x1
jax: 0.10.0
libtpu: 0.0.40
codegen_flags: <defaults>
</compile_context>

<pallas_src>
import jax
import jax.numpy as jnp
from jax.experimental import pallas as pl
from jax.experimental.pallas import tpu as pltpu

C_OUT = 20
KH = KW = 3
K10 = KH * KW + 1                      # 9 conv taps + 1 ones-row for folded bias
TAP_OFFSETS = tuple((dy, dx) for dy in (-1, 0, 1) for dx in (-1, 0, 1))


def _make_kernel(height, width, imgs):
    hw = height * width
    bl = imgs * hw
    multi = imgs > 1

    def kernel(x_ref, w_ref, m_ref, o_ref, tap_ref, *ybuf):
        # x_ref:   (1, 1, BL)      raw input, whole images flattened onto lanes
        # w_ref:   (C_OUT, K10)    conv weights (9 taps) + bias as 10th column
        # m_ref:   (K10, BL)       precomputed edge-mask slab (row 9 = ones)
        # o_ref:   (1, IMGS, C_OUT, HW)
        # tap_ref: (K10, BL)       persistent VMEM scratch for packed taps
        x = x_ref[0]                                            # (1, BL)

        # Build the 9 shifted taps straight into the packed scratch: lane
        # rotation on the XLU + a single-sublane row store each.  Rolls that
        # wrap across a row/image/slab boundary only land in masked positions.
        for k, (dy, dx) in enumerate(TAP_OFFSETS):
            s = dy * width + dx
            t = x if s == 0 else pltpu.roll(x, shift=(-s) % bl, axis=1)
            tap_ref[pl.ds(k, 1), :] = t
        # Bias row (all-ones). Rewritten every step (cheap) so the kernel has
        # no init-once state and stays safe under megacore "parallel" sharding.
        tap_ref[pl.ds(KH * KW, 1), :] = jnp.ones((1, bl), jnp.float32)

        # One dense multiply with the step-invariant, VMEM-resident mask slab
        # replaces the former per-step iota/mod/div/compare + 8 selects.
        patches = tap_ref[...] * m_ref[...]                     # (K10, BL)

        # Conv (bias folded in) as a single MXU matmul.
        conv = jnp.dot(w_ref[...], patches,
                       precision=jax.lax.Precision.HIGHEST,
                       preferred_element_type=jnp.float32)      # (C_OUT, BL)

        # ReLU + residual (x broadcasts over the 20 output channels), cast once.
        yc = (x + jnp.maximum(conv, 0.0)).astype(o_ref.dtype)   # (C_OUT, BL)

        if not multi:
            o_ref[0, 0] = yc                                    # lane-dense store
        else:
            buf = ybuf[0]
            buf[...] = yc
            def store(m, carry):
                off = pl.multiple_of(m * hw, hw)
                o_ref[0, m] = buf[:, pl.ds(off, hw)]
                return carry
            jax.lax.fori_loop(0, imgs, store, 0)

    return kernel


def _choose_imgs(n, hw, max_block_lanes):
    # Fold whole images onto the lane axis, but keep at least 2 grid steps when
    # possible: v7x has 2 TensorCores and only shards a "parallel" axis if the
    # grid has >= 2 steps.  v5e/v6e (1 TC) are unaffected by the cap.
    min_steps = 2 if n >= 2 else 1
    imgs = 1
    for d in range(1, n + 1):
        if n % d == 0 and d * hw <= max_block_lanes and (n // d) >= min_steps:
            imgs = d
    return imgs


def _edge_mask(height, width, imgs):
    # (K10, IMGS*HW) multiplicative mask: row k zeroes the positions whose
    # (dy, dx) neighbour falls outside the image ('same' zero padding); the
    # 10th row is all-ones so the folded bias row survives the mask multiply.
    hw = height * width
    hh = jnp.arange(height)
    ww = jnp.arange(width)
    rows = []
    for dy, dx in TAP_OFFSETS:
        vh = (hh + dy >= 0) & (hh + dy < height)
        vw = (ww + dx >= 0) & (ww + dx < width)
        rows.append((vh[:, None] & vw[None, :]).reshape(hw))
    rows.append(jnp.ones((hw,), jnp.bool_))
    m = jnp.stack(rows, axis=0).astype(jnp.float32)             # (K10, HW)
    return jnp.tile(m, (1, imgs))                               # (K10, BL)


def residual_block(x, w, b, *, max_block_lanes=65536,
                   vmem_limit_bytes=48 * 1024 * 1024):
    """x: (N, 1, H, W) f32; w: (C_OUT, 1, 3, 3); b: (C_OUT,) -> (N, C_OUT, H, W)."""
    n, cin, height, width = x.shape
    assert cin == 1
    hw = height * width

    imgs = _choose_imgs(n, hw, max_block_lanes)
    nb = n // imgs
    bl = imgs * hw
    # TODO(synk): images with H*W beyond max_block_lanes would need halo-based
    # spatial tiling within an image; not required at these shapes.
    # TODO(synk): if H*W is not a multiple of 128, pad each image's flat hw (and
    # the mask slab) to the next multiple of 128 so stores stay lane-dense.

    x_flat = x.reshape(nb, 1, bl)                               # pure reshape, no copy
    w10 = jnp.concatenate([w.reshape(C_OUT, KH * KW).astype(jnp.float32),
                           b.reshape(C_OUT, 1).astype(jnp.float32)], axis=1)
    mask = _edge_mask(height, width, imgs)

    flops = (2 * C_OUT * K10 + K10 + 2 * C_OUT) * n * hw
    bytes_accessed = ((x_flat.size + n * C_OUT * hw) * x.dtype.itemsize
                      + (w10.size + mask.size) * 4)

    scratch = [pltpu.VMEM((K10, bl), jnp.float32)]              # packed taps
    if imgs > 1:
        scratch.append(pltpu.VMEM((C_OUT, bl), x.dtype))        # store staging slab

    out = pl.pallas_call(
        _make_kernel(height, width, imgs),
        out_shape=jax.ShapeDtypeStruct((nb, imgs, C_OUT, hw), x.dtype),
        grid_spec=pltpu.PrefetchScalarGridSpec(
            num_scalar_prefetch=0,
            grid=(nb,),
            in_specs=[
                pl.BlockSpec((1, 1, bl), lambda i: (i, 0, 0)),
                pl.BlockSpec((C_OUT, K10), lambda i: (0, 0)),   # VMEM-resident
                pl.BlockSpec((K10, bl), lambda i: (0, 0)),      # VMEM-resident
            ],
            out_specs=pl.BlockSpec((1, imgs, C_OUT, hw), lambda i: (i, 0, 0, 0)),
            scratch_shapes=scratch,
        ),
        compiler_params=pltpu.CompilerParams(
            dimension_semantics=("parallel",),                  # no reduction axis
            vmem_limit_bytes=vmem_limit_bytes,
        ),
        cost_estimate=pl.CostEstimate(
            flops=flops, transcendentals=0, bytes_accessed=bytes_accessed),
    )(x_flat, w10, mask)

    # (nb, imgs, C_OUT, hw) -> (N, C_OUT, H, W): pure reshape, no transpose pass.
    return out.reshape(n, C_OUT, height, width)


def reference(x, w, b):
    conv = jax.lax.conv_general_dilated(
        x, w, window_strides=(1, 1), padding="SAME",
        dimension_numbers=("NCHW", "OIHW", "NCHW"))
    act = jnp.maximum(conv + b.reshape(1, C_OUT, 1, 1), 0.0)
    return x + act                                              # (N,1,H,W) broadcasts over C_OUT


if __name__ == "__main__":
    key = jax.random.PRNGKey(0)
    kx, kw, kb = jax.random.split(key, 3)

    N, H, W = 2, 16, 16
    x = jax.random.normal(kx, (N, 1, H, W), dtype=jnp.float32)
    # Deterministic synthetic parameters matching nn.Conv2d(1, 20, (3, 3)) shapes.
    w = jax.random.normal(kw, (C_OUT, 1, KH, KW), dtype=jnp.float32) * 0.1
    b = jax.random.normal(kb, (C_OUT,), dtype=jnp.float32) * 0.1

    out = jax.block_until_ready(residual_block(x, w, b))
    ref = jax.block_until_ready(reference(x, w, b))

    assert out.shape == (N, C_OUT, H, W), out.shape
    assert jnp.allclose(out, ref, atol=1e-4, rtol=1e-4), float(jnp.max(jnp.abs(out - ref)))
    print("KERNEL_OK")
</pallas_src>

<mosaic_0001>
module attributes {stable_mosaic.version = 11 : i64} {
  func.func @kernel(%arg0: i32, %arg1: memref<1x1x256xf32, #tpu.memory_space<vmem>>, %arg2: memref<20x10xf32, #tpu.memory_space<vmem>>, %arg3: memref<10x256xf32, #tpu.memory_space<vmem>>, %arg4: memref<1x1x20x256xf32, #tpu.memory_space<vmem>>, %arg5: memref<10x256xf32, #tpu.memory_space<vmem>>) attributes {dimension_semantics = [#tpu.dimension_semantics<parallel>], iteration_bounds = array<i64: 2>, scalar_prefetch = 0 : i64, scratch_operands = 1 : i64, tpu.core_type = #tpu.core_type<tc>, window_params = [{transform_indices = @transform_0, window_bounds = array<i64: 1, 1, 256>}, {pipeline_mode = #tpu.pipeline_mode<synchronous>, transform_indices = @transform_1, window_bounds = array<i64: 20, 10>}, {pipeline_mode = #tpu.pipeline_mode<synchronous>, transform_indices = @transform_2, window_bounds = array<i64: 10, 256>}, {transform_indices = @transform_3, window_bounds = array<i64: 1, 1, 20, 256>}]} {
    %c0 = arith.constant 0 : index
    %c0_0 = arith.constant 0 : index
    %c0_1 = arith.constant 0 : index
    %0 = vector.load %arg1[%c0, %c0_0, %c0_1] : memref<1x1x256xf32, #tpu.memory_space<vmem>>, vector<1x1x256xf32>
    %1 = vector.shape_cast %0 : vector<1x1x256xf32> to vector<1x256xf32>
    %c17_i32 = arith.constant 17 : i32
    %2 = tpu.dynamic_rotate %1 by %c17_i32 dim 1 : vector<1x256xf32>, i32 -> vector<1x256xf32>
    %c0_2 = arith.constant 0 : index
    %c0_3 = arith.constant 0 : index
    %3 = vector.load %arg5[%c0_2, %c0_3] : memref<10x256xf32, #tpu.memory_space<vmem>>, vector<1x256xf32>
    tpu.vector_store %arg5[%c0_2, %c0_3], %2 {strides = array<i32>} : memref<10x256xf32, #tpu.memory_space<vmem>>, vector<1x256xf32>,
    %c16_i32 = arith.constant 16 : i32
    %4 = tpu.dynamic_rotate %1 by %c16_i32 dim 1 : vector<1x256xf32>, i32 -> vector<1x256xf32>
    %c1 = arith.constant 1 : index
    %c0_4 = arith.constant 0 : index
    %5 = vector.load %arg5[%c1, %c0_4] : memref<10x256xf32, #tpu.memory_space<vmem>>, vector<1x256xf32>
    tpu.vector_store %arg5[%c1, %c0_4], %4 {strides = array<i32>} : memref<10x256xf32, #tpu.memory_space<vmem>>, vector<1x256xf32>,
    %c15_i32 = arith.constant 15 : i32
    %6 = tpu.dynamic_rotate %1 by %c15_i32 dim 1 : vector<1x256xf32>, i32 -> vector<1x256xf32>
    %c2 = arith.constant 2 : index
    %c0_5 = arith.constant 0 : index
    %7 = vector.load %arg5[%c2, %c0_5] : memref<10x256xf32, #tpu.memory_space<vmem>>, vector<1x256xf32>
    tpu.vector_store %arg5[%c2, %c0_5], %6 {strides = array<i32>} : memref<10x256xf32, #tpu.memory_space<vmem>>, vector<1x256xf32>,
    %c1_i32 = arith.constant 1 : i32
    %8 = tpu.dynamic_rotate %1 by %c1_i32 dim 1 : vector<1x256xf32>, i32 -> vector<1x256xf32>
    %c3 = arith.constant 3 : index
    %c0_6 = arith.constant 0 : index
    %9 = vector.load %arg5[%c3, %c0_6] : memref<10x256xf32, #tpu.memory_space<vmem>>, vector<1x256xf32>
    tpu.vector_store %arg5[%c3, %c0_6], %8 {strides = array<i32>} : memref<10x256xf32, #tpu.memory_space<vmem>>, vector<1x256xf32>,
    %c4 = arith.constant 4 : index
    %c0_7 = arith.constant 0 : index
    %10 = vector.load %arg5[%c4, %c0_7] : memref<10x256xf32, #tpu.memory_space<vmem>>, vector<1x256xf32>
    tpu.vector_store %arg5[%c4, %c0_7], %1 {strides = array<i32>} : memref<10x256xf32, #tpu.memory_space<vmem>>, vector<1x256xf32>,
    %c255_i32 = arith.constant 255 : i32
    %11 = tpu.dynamic_rotate %1 by %c255_i32 dim 1 : vector<1x256xf32>, i32 -> vector<1x256xf32>
    %c5 = arith.constant 5 : index
    %c0_8 = arith.constant 0 : index
    %12 = vector.load %arg5[%c5, %c0_8] : memref<10x256xf32, #tpu.memory_space<vmem>>, vector<1x256xf32>
    tpu.vector_store %arg5[%c5, %c0_8], %11 {strides = array<i32>} : memref<10x256xf32, #tpu.memory_space<vmem>>, vector<1x256xf32>,
    %c241_i32 = arith.constant 241 : i32
    %13 = tpu.dynamic_rotate %1 by %c241_i32 dim 1 : vector<1x256xf32>, i32 -> vector<1x256xf32>
    %c6 = arith.constant 6 : index
    %c0_9 = arith.constant 0 : index
    %14 = vector.load %arg5[%c6, %c0_9] : memref<10x256xf32, #tpu.memory_space<vmem>>, vector<1x256xf32>
    tpu.vector_store %arg5[%c6, %c0_9], %13 {strides = array<i32>} : memref<10x256xf32, #tpu.memory_space<vmem>>, vector<1x256xf32>,
    %c240_i32 = arith.constant 240 : i32
    %15 = tpu.dynamic_rotate %1 by %c240_i32 dim 1 : vector<1x256xf32>, i32 -> vector<1x256xf32>
    %c7 = arith.constant 7 : index
    %c0_10 = arith.constant 0 : index
    %16 = vector.load %arg5[%c7, %c0_10] : memref<10x256xf32, #tpu.memory_space<vmem>>, vector<1x256xf32>
    tpu.vector_store %arg5[%c7, %c0_10], %15 {strides = array<i32>} : memref<10x256xf32, #tpu.memory_space<vmem>>, vector<1x256xf32>,
    %c239_i32 = arith.constant 239 : i32
    %17 = tpu.dynamic_rotate %1 by %c239_i32 dim 1 : vector<1x256xf32>, i32 -> vector<1x256xf32>
    %c8 = arith.constant 8 : index
    %c0_11 = arith.constant 0 : index
    %18 = vector.load %arg5[%c8, %c0_11] : memref<10x256xf32, #tpu.memory_space<vmem>>, vector<1x256xf32>
    tpu.vector_store %arg5[%c8, %c0_11], %17 {strides = array<i32>} : memref<10x256xf32, #tpu.memory_space<vmem>>, vector<1x256xf32>,
    %cst = arith.constant 1.000000e+00 : f32
    %19 = vector.broadcast %cst : f32 to vector<1x256xf32>
    %c9 = arith.constant 9 : index
    %c0_12 = arith.constant 0 : index
    %20 = vector.load %arg5[%c9, %c0_12] : memref<10x256xf32, #tpu.memory_space<vmem>>, vector<1x256xf32>
    tpu.vector_store %arg5[%c9, %c0_12], %19 {strides = array<i32>} : memref<10x256xf32, #tpu.memory_space<vmem>>, vector<1x256xf32>,
    %c0_13 = arith.constant 0 : index
    %c0_14 = arith.constant 0 : index
    %21 = vector.load %arg5[%c0_13, %c0_14] : memref<10x256xf32, #tpu.memory_space<vmem>>, vector<10x256xf32>
    %c0_15 = arith.constant 0 : index
    %c0_16 = arith.constant 0 : index
    %22 = vector.load %arg3[%c0_15, %c0_16] : memref<10x256xf32, #tpu.memory_space<vmem>>, vector<10x256xf32>
    %23 = arith.mulf %21, %22 : vector<10x256xf32>
    %c0_17 = arith.constant 0 : index
    %c0_18 = arith.constant 0 : index
    %24 = vector.load %arg2[%c0_17, %c0_18] : memref<20x10xf32, #tpu.memory_space<vmem>>, vector<20x10xf32>
    %cst_19 = arith.constant dense<0.000000e+00> : vector<20x256xf32>
    %25 = tpu.matmul %24, %23, %cst_19 {dimension_numbers = #tpu.dot_dimension_numbers<[1], [0], [0], [1], [0, 0, 1, 1], [], []>, precision = #tpu.contract_precision<fp32>} : vector<20x10xf32>, vector<10x256xf32>, vector<20x256xf32> -> vector<20x256xf32>
    %cst_20 = arith.constant 0.000000e+00 : f32
    %26 = vector.broadcast %cst_20 : f32 to vector<20x256xf32>
    %27 = arith.maximumf %25, %26 : vector<20x256xf32>
    %28 = vector.broadcast %1 : vector<1x256xf32> to vector<20x256xf32>
    %29 = arith.addf %28, %27 : vector<20x256xf32>
    %c0_21 = arith.constant 0 : index
    %c0_22 = arith.constant 0 : index
    %c0_23 = arith.constant 0 : index
    %c0_24 = arith.constant 0 : index
    %30 = vector.load %arg4[%c0_21, %c0_22, %c0_23, %c0_24] : memref<1x1x20x256xf32, #tpu.memory_space<vmem>>, vector<1x1x20x256xf32>
    %31 = vector.shape_cast %30 : vector<1x1x20x256xf32> to vector<20x256xf32>
    %32 = vector.shape_cast %29 : vector<20x256xf32> to vector<1x1x20x256xf32>
    tpu.vector_store %arg4[%c0_21, %c0_22, %c0_23, %c0_24], %32 {strides = array<i32>} : memref<1x1x20x256xf32, #tpu.memory_space<vmem>>, vector<1x1x20x256xf32>,
    return
  }
  func.func @transform_0(%arg0: i32) -> (i32, i32, i32) {
    %c0_i32 = arith.constant 0 : i32
    %c0_i32_0 = arith.constant 0 : i32
    %c0_i32_1 = arith.constant 0 : i32
    return %arg0, %c0_i32, %c0_i32_0 : i32, i32, i32
  }
  func.func @transform_1(%arg0: i32) -> (i32, i32) {
    %c0_i32 = arith.constant 0 : i32
    %c0_i32_0 = arith.constant 0 : i32
    %c0_i32_1 = arith.constant 0 : i32
    return %c0_i32, %c0_i32_0 : i32, i32
  }
  func.func @transform_2(%arg0: i32) -> (i32, i32) {
    %c0_i32 = arith.constant 0 : i32
    %c0_i32_0 = arith.constant 0 : i32
    %c0_i32_1 = arith.constant 0 : i32
    return %c0_i32, %c0_i32_0 : i32, i32
  }
  func.func @transform_3(%arg0: i32) -> (i32, i32, i32, i32) {
    %c0_i32 = arith.constant 0 : i32
    %c0_i32_0 = arith.constant 0 : i32
    %c0_i32_1 = arith.constant 0 : i32
    %c0_i32_2 = arith.constant 0 : i32
    return %arg0, %c0_i32, %c0_i32_0, %c0_i32_1 : i32, i32, i32, i32
  }
}

</mosaic_0001>

<bundles_post_ra>
// kernel: tpu_custom_call.1
= control target key start
LH: loop header
LB: loop body
LE: loop exit
PB: predicated region body
PF: predicated region fallthrough
CT: control target
= control target key end

     0   :  { %s1231_s12 = smov 0   ;;  %s1405_s0 = inlined_call_operand.vmem [shape: f32[2,1,256], index: 0, kind: input, shape index: {}]   ;;  %s1406_s1 = inlined_call_operand.vmem [shape: f32[20,10], index: 1, kind: input, shape index: {}]   ;;  %s1407_s2 = inlined_call_operand.vmem [shape: f32[10,256], index: 2, kind: input, shape index: {}]   ;;  %s1408_s3 = inlined_call_operand.vmem [shape: f32[2,1,20,256], index: 3, kind: output, shape index: {}]  }
   0x1 LB: > { %s1109_s13 = sadd.s32 4294967295, %s1198_s12   ;;  %p1113_p0 = scmp.ge.s32.totalorder %s1198_s12, 1  ;;  %s1198_s12 = sphi %s1231_s12, %s13_s12  }
   0x2   : > { %p136_p1 = scmp.lt.s32.totalorder %s1198_s12, 3 }
   0x4   : > { %p137_p2 = pnand %p1113_p0, %p136_p1 }
   0x5   : > { %p159_p3 = scmp.lt.s32.totalorder (!%p137_p2), %s1109_s13, 1  ;;  %v170_v0 = vlaneseq (!%p137_p2)  ;;  %v1200_v7 = vmov (!%p137_p2), 1.0   ;;  %s1201_s18 = smov (!%p137_p2), 17   ;;  %v1209_v9 = vmov (!%p137_p2), 0.0   ;;  %v1210_v10 = vmov (!%p137_p2), 1966171168  }
   0x6   : > { %140 = sbr.rel (%p137_p2) target bundleno = 440 (0x1b8), region = 32  ;;  %s1202_s19 = smov (!%p137_p2), 111   ;;  %515 = vmatprep.mubr.f32.mxu1 (!%p137_p2), %v1209_v9  ;;  %820 = vmatprep.mubr.f32.mxu0 (!%p137_p2), %v1209_v9  ;;  %v193_v11 = vunpack.c.l.s4 (!%p137_p2), %v1210_v10  ;;  %v422_v62 = vld [vmem:[%s1407_s2 + $0x18] sm:$0x3] (!%p137_p2)  ;;  %v427_v63 = vld [vmem:[%s1406_s1] sm:$0xff] (!%p137_p2)  ;;  %vm430_vm9 = vcmask (!%p137_p2), 80896  }
   0x7   : > { %v171_v1 = vshrl.u32 (!%p137_p2), %v170_v0, 7  ;;  %vm1242_vm0 = vcmp.lt.s32.totalorder (!%p137_p2), %v170_v0, 256  ;;  %s1203_s20 = smov (!%p137_p2), 16   ;;  %s1204_s21 = smov (!%p137_p2), 15   ;;  %v1275_v12 = vand.u32 (!%p137_p2), 127, %v170_v0  ;;  %vm440_vm10 = vcmask (!%p137_p2), 1041408  }
   0x8   : > { %413 = vst.msk [vmem:[#allocation2 + $0x11] ss:$8 sm:$0x3] (!%p137_p2), %vm1242_vm0, %v1200_v7  ;;  %s1205_s22 = smov (!%p137_p2), 1   ;;  %s1206_s23 = smov (!%p137_p2), 127   ;;  %v194_v13 = vunpack.c.0.s8 (!%p137_p2), %v193_v11 }
   0x9   : > { %v172_v2 = vsub.s32 (!%p137_p2), 0, %v171_v1  ;;  %v176_v4 = vsub.s32 (!%p137_p2), 1, %v171_v1  ;;  %s1207_s24 = smov (!%p137_p2), 113   ;;  %s1208_s25 = smov (!%p137_p2), 112   ;;  %vm186_vm1 = vcmp.lt.s32.totalorder (!%p137_p2), %v1275_v12, 17  ;;  %vm388_vm2 = vcmp.lt.s32.totalorder (!%p137_p2), %v1275_v12, 111 }
   0xa   : > { %v1279_v16 = vsub.s32 (!%p137_p2), %v194_v13, %v171_v1  ;;  %vm217_vm3 = vcmp.lt.s32.totalorder (!%p137_p2), %v1275_v12, 16  ;;  %vm245_vm4 = vcmp.lt.s32.totalorder (!%p137_p2), %v1275_v12, 15  ;;  %vm273_vm5 = vcmp.lt.s32.totalorder (!%p137_p2), %v1275_v12, 1  ;;  %v421_v7 = vld [vmem:[%s1407_s2 + $0x10] sm:$0x3] (!%p137_p2) }
   0xb   : > { %vm304_vm6 = vcmp.lt.s32.totalorder (!%p137_p2), %v1275_v12, 127  ;;  %vm332_vm7 = vcmp.lt.s32.totalorder (!%p137_p2), %v1275_v12, 113  ;;  %vm360_vm8 = vcmp.lt.s32.totalorder (!%p137_p2), %v1275_v12, 112 }
   0xd   : > { %s1412_s13 = smov (!%p159_p3, %s1109_s13), 1 }
   0xe   : > { %s1114_s14 = sshll.u32 %s1412_s13, 1  ;;  %s1172_s15 = smul.u32 48, %s1412_s13 }
   0xf   : > { %s162_s17 = scalar_lea.vmem %s1405_s0, %s1114_s14 }
  0x10   : > { %v168_v5 = vld [vmem:[%s162_s17] sm:$0x3] }
  0x11   : > { %v1249_v6 = vrot.slane %v168_v5, %v172_v2  ;;  %298 = vst.msk [vmem:[#allocation2 + $0x4] ss:$8 sm:$0x3] %vm1242_vm0, %v168_v5  ;;  %v1257_v8 = vrot.slane %v168_v5, %v176_v4 }
  0x13   : > { %180 = vrot.lane.b32.xlu1 %v1249_v6, %s1201_s18  ;;  %384 = vrot.lane.b32.xlu0 %v1249_v6, %s1202_s19 }
  0x17   : > { %182 = vrot.lane.b32.xlu1 %v1257_v8, %s1201_s18  ;;  %386 = vrot.lane.b32.xlu0 %v1257_v8, %s1202_s19  ;;  %s167_s18 = scalar_lea.vmem %s1408_s3, %s1172_s15 }
  0x1b   : > { %215 = vrot.lane.b32.xlu1 %v1257_v8, %s1203_s20  ;;  %213 = vrot.lane.b32.xlu0 %v1249_v6, %s1203_s20 }
  0x1f   : > { %243 = vrot.lane.b32.xlu1 %v1257_v8, %s1204_s21  ;;  %241 = vrot.lane.b32.xlu0 %v1249_v6, %s1204_s21 }
  0x23   : > { %271 = vrot.lane.b32.xlu1 %v1257_v8, %s1205_s22  ;;  %269 = vrot.lane.b32.xlu0 %v1249_v6, %s1205_s22 }
  0x27   : > { %302 = vrot.lane.b32.xlu1 %v1257_v8, %s1206_s23  ;;  %300 = vrot.lane.b32.xlu0 %v1249_v6, %s1206_s23 }
  0x2b   : > { %330 = vrot.lane.b32.xlu1 %v1257_v8, %s1207_s24  ;;  %328 = vrot.lane.b32.xlu0 %v1249_v6, %s1207_s24 }
  0x2f   : > { %358 = vrot.lane.b32.xlu1 %v1257_v8, %s1208_s25  ;;  %356 = vrot.lane.b32.xlu0 %v1249_v6, %s1208_s25 }
  0x85   : > { %v181_v14 = vpop.permute.xlu1 %180  ;;  %v385_v15 = vpop.permute.xlu0 %384 }
  0x89   : > { %v183_v17 = vpop.permute.xlu1 %182  ;;  %v387_v18 = vpop.permute.xlu0 %386 }
  0x8a   : > { %v187_v19 = vsel %vm186_vm1, %v181_v14, %v183_v17  ;;  %v188_v20 = vsel %vm186_vm1, %v183_v17, %v181_v14  ;;  %v389_v21 = vsel %vm388_vm2, %v385_v15, %v387_v18  ;;  %v390_v22 = vsel %vm388_vm2, %v387_v18, %v385_v15  ;;  %v428_v18 = vld [vmem:[%s1406_s1 + $0x8] sm:$0xff] }
  0x8b   : > { %v191_v23 = vcombine.low %v188_v20, %v187_v19  ;;  %v393_v24 = vcombine.low %v389_v21, %v390_v22  ;;  %v432_v14 = vsel %vm430_vm9, %v427_v63, 0  ;;  %v435_v22 = vsel %vm430_vm9, %v428_v18, 0 }
  0x8c   : > { %v1329_v20 = vand.u32 4294901760, %v432_v14 }
  0x8d   : > { %v198_v25 = vrot.slane %v191_v23, %v1279_v16  ;;  %v400_v26 = vrot.slane %v393_v24, %v1279_v16  ;;  %v216_v27 = vpop.permute.xlu1 %215  ;;  %v214_v28 = vpop.permute.xlu0 %213 }
  0x8e   : > { %v218_v29 = vsel %vm217_vm3, %v214_v28, %v216_v27  ;;  %v219_v30 = vsel %vm217_vm3, %v216_v27, %v214_v28  ;;  %v1341_v27 = vand.u32 4294901760, %v435_v22 }
  0x8f   : > { %v205_v31 = vrot.slane %v198_v25, %v1279_v16  ;;  %v407_v32 = vrot.slane %v400_v26, %v1279_v16  ;;  %v222_v33 = vcombine.low %v219_v30, %v218_v29  ;;  %v429_v25 = vld [vmem:[%s1406_s1 + $0x10] sm:$0xf]  ;;  %v1339_v26 = vsub.f32 %v432_v14, %v1329_v20  ;;  %v420_v30 = vld [vmem:[%s1407_s2 + $0x8] sm:$0xff] }
  0x91   : > { %211 = vst.msk [vmem:[#allocation2] ss:$8 sm:$0x3] %vm1242_vm0, %v205_v31  ;;  %410 = vst.msk [vmem:[#allocation2 + $0x10] ss:$8 sm:$0x3] %vm1242_vm0, %v407_v32  ;;  %v229_v34 = vrot.slane %v222_v33, %v1279_v16  ;;  %v244_v35 = vpop.permute.xlu1 %243  ;;  %v242_v36 = vpop.permute.xlu0 %241  ;;  %v1352_v32 = vsub.f32 %v435_v22, %v1341_v27 }
  0x92   : > { %v246_v37 = vsel %vm245_vm4, %v242_v36, %v244_v35  ;;  %v247_v38 = vsel %vm245_vm4, %v244_v35, %v242_v36  ;;  %v419_v31 = vld [vmem:[%s1407_s2] sm:$0xff]  ;;  %v518_v3 = vand.u32 4294901760, %v1339_v26 }
  0x93   : > { %v236_v39 = vrot.slane %v229_v34, %v1279_v16  ;;  %v250_v40 = vcombine.low %v247_v38, %v246_v37 }
  0x95   : > { %239 = vst.msk [vmem:[#allocation2 + $0x1] ss:$8 sm:$0x3] %vm1242_vm0, %v236_v39  ;;  %v257_v41 = vrot.slane %v250_v40, %v1279_v16  ;;  %v272_v42 = vpop.permute.xlu1 %271  ;;  %v270_v43 = vpop.permute.xlu0 %269  ;;  %v519_v40 = vsub.f32 %v1339_v26, %v518_v3 }
  0x96   : > { %v274_v44 = vsel %vm273_vm5, %v270_v43, %v272_v42  ;;  %v275_v45 = vsel %vm273_vm5, %v272_v42, %v270_v43 }
  0x97   : > { %v264_v46 = vrot.slane %v257_v41, %v1279_v16  ;;  %v278_v47 = vcombine.low %v275_v45, %v274_v44  ;;  %v529_v41 = vand.u32 4294901760, %v1352_v32 }
  0x98   : > { %v418_v4 = vld [vmem:[#allocation2 + $0x18] sm:$0x3]  ;;  %v417_v5 = vld [vmem:[#allocation2 + $0x10] sm:$0x3] }
  0x99   : > { %267 = vst.msk [vmem:[#allocation2 + $0x2] ss:$8 sm:$0x3] %vm1242_vm0, %v264_v46  ;;  %v285_v48 = vrot.slane %v278_v47, %v1279_v16  ;;  %v303_v49 = vpop.permute.xlu1 %302  ;;  %v301_v50 = vpop.permute.xlu0 %300  ;;  %v426_v15 = vmul.f32 %v422_v62, %v418_v4  ;;  %v425_v17 = vmul.f32 %v421_v7, %v417_v5 }
  0x9a   : > { %v305_v51 = vsel %vm304_vm6, %v301_v50, %v303_v49  ;;  %v306_v52 = vsel %vm304_vm6, %v303_v49, %v301_v50 }
  0x9b   : > { %v292_v53 = vrot.slane %v285_v48, %v1279_v16  ;;  %v309_v54 = vcombine.low %v305_v51, %v306_v52  ;;  %v445_v23 = vsel %vm440_vm10, %v426_v15, 0  ;;  %v442_v24 = vsel %vm440_vm10, %v425_v17, 0 }
  0x9c   : > { %v451_v28 = vand.u32 4294901760, %v445_v23  ;;  %v453_v29 = vand.u32 4294901760, %v442_v24  ;;  %v520_v51 = vand.u32 4294901760, %v519_v40  ;;  %v530_v52 = vsub.f32 %v1352_v32, %v529_v41 }
  0x9d   : > { %295 = vst.msk [vmem:[#allocation2 + $0x3] ss:$8 sm:$0x3] %vm1242_vm0, %v292_v53  ;;  %v316_v55 = vrot.slane %v309_v54, %v1279_v16  ;;  %v331_v56 = vpop.permute.xlu1 %330  ;;  %v329_v57 = vpop.permute.xlu0 %328 }
  0x9e   : > { %v333_v58 = vsel %vm332_vm7, %v329_v57, %v331_v56  ;;  %v334_v59 = vsel %vm332_vm7, %v331_v56, %v329_v57  ;;  %v562_v34 = vsub.f32 %v445_v23, %v451_v28  ;;  %v568_v35 = vsub.f32 %v442_v24, %v453_v29 }
  0x9f   : > { %v323_v60 = vrot.slane %v316_v55, %v1279_v16  ;;  %v337_v61 = vcombine.low %v333_v58, %v334_v59  ;;  %v531_v62 = vand.u32 4294901760, %v530_v52 }
  0xa0   : > { %v563_v45 = vand.u32 4294901760, %v562_v34  ;;  %v569_v46 = vand.u32 4294901760, %v568_v35 }
  0xa1   : > { %326 = vst.msk [vmem:[#allocation2 + $0x5] ss:$8 sm:$0x3] %vm1242_vm0, %v323_v60  ;;  %v344_v0 = vrot.slane %v337_v61, %v1279_v16  ;;  %v359_v1 = vpop.permute.xlu1 %358  ;;  %v357_v2 = vpop.permute.xlu0 %356 }
  0xa2   : > { %v361_v10 = vsel %vm360_vm8, %v357_v2, %v359_v1  ;;  %v362_v11 = vsel %vm360_vm8, %v359_v1, %v357_v2  ;;  %v564_v56 = vsub.f32 %v562_v34, %v563_v45  ;;  %v570_v57 = vsub.f32 %v568_v35, %v569_v46 }
  0xa3   : > { %v351_v12 = vrot.slane %v344_v0, %v1279_v16  ;;  %v365_v13 = vcombine.low %v361_v10, %v362_v11 }
  0xa4   : > { %v565_v1 = vand.u32 4294901760, %v564_v56  ;;  %v571_v4 = vand.u32 4294901760, %v570_v57 }
  0xa5   : > { %354 = vst.msk [vmem:[#allocation2 + $0x6] ss:$8 sm:$0x3] %vm1242_vm0, %v351_v12  ;;  %v372_v19 = vrot.slane %v365_v13, %v1279_v16 }
  0xa7   : > { %v379_v21 = vrot.slane %v372_v19, %v1279_v16  ;;  %v438_v16 = vsel %vm430_vm9, %v429_v25, 0 }
  0xa8   : > { %v1354_v33 = vand.u32 4294901760, %v438_v16 }
  0xa9   : > { %382 = vst.msk [vmem:[#allocation2 + $0x7] ss:$8 sm:$0x3] %vm1242_vm0, %v379_v21 }
  0xaa   : > { %v1359_v42 = vsub.f32 %v438_v16, %v1354_v33 }
  0xac   : > { %v540_v53 = vand.u32 4294901760, %v1359_v42 }
  0xae   : > { %v541_v63 = vsub.f32 %v1359_v42, %v540_v53 }
  0xb0   : > { %v416_v36 = vld [vmem:[#allocation2 + $0x8] sm:$0xff]  ;;  %v415_v37 = vld [vmem:[#allocation2] sm:$0xff]  ;;  %v542_v11 = vand.u32 4294901760, %v541_v63 }
  0xb1   : > { %v424_v38 = vmul.f32 %v420_v30, %v416_v36  ;;  %v423_v39 = vmul.f32 %v419_v31, %v415_v37 }
  0xb3   : > { %v447_v43 = vand.u32 4294901760, %v424_v38  ;;  %v449_v44 = vand.u32 4294901760, %v423_v39 }
  0xb5   : > { %v1118_v47 = vpack.c.bf16 %v451_v28, %v447_v43  ;;  %v550_v48 = vsub.f32 %v424_v38, %v447_v43  ;;  %v1120_v49 = vpack.c.bf16 %v453_v29, %v449_v44  ;;  %v556_v50 = vsub.f32 %v423_v39, %v449_v44 }
  0xb7   : > { %1119 = vmatprep.subr.bf16.mxu1 %v1118_v47  ;;  %1131 = vmatprep.subr.bf16.mxu0 %v1118_v47  ;;  %v551_v54 = vand.u32 4294901760, %v550_v48  ;;  %v557_v55 = vand.u32 4294901760, %v556_v50  ;;  %v1126_v10 = vpack.c.bf16 %v562_v34, %v550_v48  ;;  %v1128_v12 = vpack.c.bf16 %v568_v35, %v556_v50 }
  0xb8   : > { %1121 = vmatpush1.bf16.msra.mxu1 %v1120_v49  ;;  %1133 = vmatpush1.bf16.msra.mxu0 %v1120_v49 }
  0xb9   : > { %v1134_v58 = vpack.c.bf16 %v563_v45, %v551_v54  ;;  %v1136_v59 = vpack.c.bf16 %v569_v46, %v557_v55  ;;  %v552_v60 = vsub.f32 %v550_v48, %v551_v54  ;;  %v558_v61 = vsub.f32 %v556_v50, %v557_v55 }
  0xbb   : > { %521 = vmatmul.mubr.f32.vlgmr.msra.gmra.mrb[0].mxu1 %v520_v51  ;;  %824 = vmatmul.mubr.f32.vlgmr.msra.gmra.mrb[0].mxu0 %v518_v3  ;;  %v553_v0 = vand.u32 4294901760, %v552_v60  ;;  %v559_v2 = vand.u32 4294901760, %v558_v61 }
  0xbc   : > { %1135 = vmatprep.subr.bf16.mxu0 %v1134_v58  ;;  %526 = vmatprep.mubr.f32.mxu1 %v1209_v9 }
  0xbd   : > { %1137 = vmatpush1.bf16.msra.mxu0 %v1136_v59  ;;  %829 = vmatprep.mubr.f32.mxu0 %v1209_v9  ;;  %v1122_v5 = vpack.c.bf16 %v565_v1, %v553_v0  ;;  %v1124_v7 = vpack.c.bf16 %v571_v4, %v559_v2 }
  0xbe   : > { %1139 = vmatprep.subr.bf16.mxu0 %v1118_v47 }
  0xbf   : > { %532 = vmatmul.mubr.f32.gmra.mrb[2].mxu1 %v531_v62  ;;  %1123 = vmatprep.subr.bf16.mxu1 %v1122_v5 }
  0xc0   : > { %833 = vmatmul.mubr.f32.gmra.mrb[2].mxu0 %v529_v41  ;;  %1125 = vmatpush1.bf16.msra.mxu1 %v1124_v7 }
  0xc1   : > { %1127 = vmatprep.subr.bf16.mxu1 %v1126_v10  ;;  %537 = vmatprep.mubr.f32.mxu1 %v1209_v9 }
  0xc2   : > { %838 = vmatprep.mubr.f32.mxu0 %v1209_v9 }
  0xc3   : > { %543 = vmatmul.mubr.f32.gmra.mrb[4].mxu1 %v542_v11 }
  0xc4   : > { %842 = vmatmul.mubr.f32.gmra.mrb[4].mxu0 %v540_v53  ;;  %633 = vmatprep.mubr.f32.mxu1 %v1209_v9 }
  0xc5   : > { %924 = vmatprep.mubr.f32.mxu0 %v1209_v9 }
  0xc7   : > { %635 = vmatmul.mubr.f32.vlgmr.msra.gmra.mrb[0].mxu1 %v1329_v20 }
  0xc8   : > { %1129 = vmatpush1.bf16.msra.mxu1 %v1128_v12  ;;  %926 = vmatmul.mubr.f32.vlgmr.msra.gmra.mrb[0].mxu0 %v1329_v20 }
  0xc9   : > { %1141 = vmatpush1.bf16.msra.mxu0 %v1120_v49  ;;  %640 = vmatprep.mubr.f32.mxu1 %v1209_v9 }
  0xca   : > { %931 = vmatprep.mubr.f32.mxu0 %v1209_v9 }
  0xcb   : > { %642 = vmatmul.mubr.f32.gmra.mrb[2].mxu1 %v1341_v27 }
  0xcc   : > { %933 = vmatmul.mubr.f32.gmra.mrb[2].mxu0 %v1341_v27  ;;  %647 = vmatprep.mubr.f32.mxu1 %v1209_v9 }
  0xcd   : > { %938 = vmatprep.mubr.f32.mxu0 %v1209_v9 }
  0xcf   : > { %649 = vmatmul.mubr.f32.gmra.mrb[4].mxu1 %v1354_v33 }
  0xd0   : > { %940 = vmatmul.mubr.f32.gmra.mrb[4].mxu0 %v1354_v33  ;;  %727 = vmatprep.mubr.f32.mxu1 %v1209_v9 }
  0xd1   : > { %1014 = vmatprep.mubr.f32.mxu0 %v1209_v9 }
  0xd3   : > { %730 = vmatmul.mubr.f32.vlgmr.msra.gmra.mrb[0].mxu1 %v1339_v26 }
  0xd4   : > { %1016 = vmatmul.mubr.f32.vlgmr.msra.gmra.mrb[0].mxu0 %v1329_v20  ;;  %735 = vmatprep.mubr.f32.mxu1 %v1209_v9 }
  0xd5   : > { %1021 = vmatprep.mubr.f32.mxu0 %v1209_v9 }
  0xd7   : > { %738 = vmatmul.mubr.f32.gmra.mrb[2].mxu1 %v1352_v32 }
  0xd8   : > { %1023 = vmatmul.mubr.f32.gmra.mrb[2].mxu0 %v1341_v27  ;;  %743 = vmatprep.mubr.f32.mxu1 %v1209_v9 }
  0xd9   : > { %1028 = vmatprep.mubr.f32.mxu0 %v1209_v9 }
  0xdb   : > { %746 = vmatmul.mubr.f32.gmra.mrb[4].mxu1 %v1359_v42 }
  0xdc   : > { %1030 = vmatmul.mubr.f32.gmra.mrb[4].mxu0 %v1354_v33 }
 0x1a6   : > { %v731_v13 = vpop.f32.mrb[0].mxu1 }
 0x1a7   : > { %v1017_v14 = vpop.f32.mrb[0].mxu0  ;;  %v733_v15 = vpop.f32.mrb[1].mxu1 }
 0x1a8   : > { %v1142_v17 = vadd.f32 %v1017_v14, %v731_v13  ;;  %v1019_v18 = vpop.f32.mrb[1].mxu0 }
 0x1a9   : > { %v1143_v19 = vadd.f32 %v1019_v18, %v733_v15 }
 0x1aa   : > { %v1036_v20 = vmax.f32 %v1142_v17, 0.0  ;;  %v739_v21 = vpop.f32.mrb[2].mxu1 }
 0x1ab   : > { %v1037_v22 = vmax.f32 %v1143_v19, 0.0  ;;  %v1024_v23 = vpop.f32.mrb[2].mxu0  ;;  %v741_v9 = vpop.f32.mrb[3].mxu1 }
 0x1ac   : > { %v1042_v24 = vadd.f32 %v1036_v20, %v1249_v6  ;;  %v1144_v25 = vadd.f32 %v1024_v23, %v739_v21  ;;  %v1026_v26 = vpop.f32.mrb[3].mxu0 }
 0x1ad   : > { %v1043_v27 = vadd.f32 %v1037_v22, %v1257_v8  ;;  %v1145_v28 = vadd.f32 %v1026_v26, %v741_v9 }
 0x1ae   : > { %1048 = vst [vmem:[%s167_s18] sm:$0xff] %v1042_v24  ;;  %v1038_v29 = vmax.f32 %v1144_v25, 0.0  ;;  %v747_v16 = vpop.f32.mrb[4].mxu1 }
 0x1af   : > { %1049 = vst [vmem:[%s167_s18 + $0x8] sm:$0xff] %v1043_v27  ;;  %v1039_v30 = vmax.f32 %v1145_v28, 0.0  ;;  %v1031_v31 = vpop.f32.mrb[4].mxu0  ;;  %v749_v3 = vpop.f32.mrb[5].mxu1 }
 0x1b0   : > { %v1044_v32 = vadd.f32 %v1038_v29, %v1249_v6  ;;  %v1146_v33 = vadd.f32 %v1031_v31, %v747_v16  ;;  %v1033_v34 = vpop.f32.mrb[5].mxu0 }
 0x1b1   : > { %v1045_v35 = vadd.f32 %v1039_v30, %v1257_v8  ;;  %v1147_v36 = vadd.f32 %v1033_v34, %v749_v3 }
 0x1b2   : > { %1050 = vst [vmem:[%s167_s18 + $0x10] sm:$0xff] %v1044_v32  ;;  %v1040_v37 = vmax.f32 %v1146_v33, 0.0 }
 0x1b3   : > { %1051 = vst [vmem:[%s167_s18 + $0x18] sm:$0xff] %v1045_v35  ;;  %v1041_v38 = vmax.f32 %v1147_v36, 0.0 }
 0x1b4   : > { %v1046_v39 = vadd.f32 %v1040_v37, %v1249_v6 }
 0x1b5   : > { %v1047_v40 = vadd.f32 %v1041_v38, %v1257_v8 }
 0x1b6   : > { %1052 = vst [vmem:[%s167_s18 + $0x20] sm:$0xf] %v1046_v39 }
 0x1b7   : > { %1053 = vst [vmem:[%s167_s18 + $0x28] sm:$0xf] %v1047_v40 }
 0x1b8 PF: > { %s13_s12 = sadd.s32 1, %s1198_s12  }
 0x1b9   : > { %p10_p4 = scmp.ge.s32.totalorder %s13_s12, 4  }
 0x1bb   :  { %12 = sbr.rel (!%p10_p4) target bundleno = 1 (0x1), region = 71 }

</bundles_post_ra>
